<compile_context>
chip_gen: v6e
topology: v6e:2x2x1
jax: 0.10.0
libtpu: 0.0.40
codegen_flags: <defaults>
</compile_context>

<pallas_src>
import functools
import math
from typing import NamedTuple

import jax
import jax.numpy as jnp
from jax.experimental import pallas as pl
from jax.experimental.pallas import tpu as pltpu


# ----------------------------------------------------------------------------- utils


def _round_up(v, m):
    return ((v + m - 1) // m) * m


def _split(total, max_tile, align):
    """Pick (tile, num) with tile a multiple of `align`, num*tile >= total, and
    padding minimized for the requested max tile size."""
    num = max(1, -(-total // max_tile))
    tile = _round_up(-(-total // num), align)
    return tile, num


def _tpu_generation_info():
    """(physical VMEM bytes, tensorcores per chip, M-tile alignment) — best effort."""
    kind = ""
    try:
        kind = jax.devices()[0].device_kind.lower()
    except Exception:
        pass
    vmem_phys = None
    try:
        vmem_phys = int(getattr(pltpu.get_tpu_info(), "vmem_capacity_bytes", 0)) or None
    except Exception:
        vmem_phys = None
    if vmem_phys is None:
        # Conservative fallback (covers v7x / unknown); v5e & v6e have 128 MiB.
        vmem_phys = (128 << 20) if ("v5" in kind or "v6" in kind) else (64 << 20)
    num_cores = 2 if "v7" in kind else 1
    tm_align = 128 if "v5" in kind else 256
    return vmem_phys, num_cores, tm_align


# ------------------------------------------------------------------- operator prepare


class PreparedOperator(NamedTuple):
    a_t: jax.Array     # (n_padded, m_padded) = (tk*num_k, tm*num_m), compute dtype
    n: int             # original N (= prod of x's trailing dims)
    m: int             # original M (= y.shape[1])
    tk: int
    tm: int
    num_k: int
    num_m: int
    vmem_budget: int


def prepare_operator(a_matrix, *, compute_dtype=jnp.bfloat16, tk=1024, tm=None,
                     batch_hint=8):
    """One-time preparation (call OUTSIDE the solver loop).

    a_matrix: (M, N) measurement operator.  Returns a PreparedOperator holding the
    transposed, tile-aligned, zero-padded, dtype-cast A^T plus the tiling metadata,
    so data_fidelity_forward does no per-call O(N*M) work.
    """
    a_matrix = jnp.asarray(a_matrix)
    M, N = a_matrix.shape
    itemsize = jnp.dtype(compute_dtype).itemsize
    vmem_phys, num_cores, tm_align = _tpu_generation_info()
    budget = (3 * vmem_phys) // 4
    B = max(8, int(batch_hint))

    # Reduction (N) tiling: 128-aligned (x lane dim / A_T sublane dim), minimal pad.
    tk_sel, num_k = _split(N, max(128, int(tk)), 128)

    # Output (M) tiling: prefer a single full-width tile (contiguous A_T DMA rows),
    # bounded by the VMEM budget; shrink tk first if even one M tile can't fit.
    fixed = 10 << 20                                  # x-residency + slack allowance
    per_col = 2 * tk_sel * itemsize + 12 * B          # A_T (x2) + y (x2, f32) + acc
    while (budget - fixed) // per_col < tm_align and tk_sel > 128:
        tk_sel, num_k = _split(N, max(128, tk_sel // 2), 128)
        per_col = 2 * tk_sel * itemsize + 12 * B
    tm_budget = max(tm_align, ((budget - fixed) // per_col) // tm_align * tm_align)

    m_full = _round_up(M, tm_align)
    # v7x: give each TensorCore its own M tile when M is large enough to split.
    num_m_min = num_cores if m_full >= num_cores * tm_align else 1
    if tm is None:
        tm_cap = tm_budget
    else:
        tm_cap = min(max(tm_align, _round_up(int(tm), tm_align)), tm_budget)
    num_m = max(num_m_min, -(-m_full // tm_cap))
    tm_sel = _round_up(-(-M // num_m), tm_align)

    n_padded = tk_sel * num_k
    m_padded = tm_sel * num_m

    a_t = jnp.transpose(a_matrix).astype(compute_dtype)          # (N, M)
    if n_padded != N or m_padded != M:
        # Exact zero-padding: padded columns/rows contribute exactly zero.
        a_t = jnp.pad(a_t, ((0, n_padded - N), (0, m_padded - M)))

    return PreparedOperator(a_t, int(N), int(M), int(tk_sel), int(tm_sel),
                            int(num_k), int(num_m), int(budget))


# --------------------------------------------------------------------------- kernel


def _data_fidelity_kernel(x_ref, at_ref, y_ref, out_ref, acc_ref, *, x_resident):
    """Fused  u_tile = x @ A_T[:, m-tile]  and  0.5 * sum((u_tile - y_tile)^2).

    Grid: (m, k) with k (the N reduction axis) last.
    acc_ref: persistent (B, tm) f32 VMEM accumulator, re-initialized per m-tile.
    """
    k = pl.program_id(1)

    @pl.when(k == 0)
    def _init():
        # Fold y into the accumulator: acc starts at -y, so after the reduction the
        # accumulator IS the residual (no epilogue subtract).
        acc_ref[...] = -y_ref[...].astype(jnp.float32)

    if x_resident:
        x_tile = x_ref[k]          # (B, tk): dynamic leading-axis index, VMEM-resident
    else:
        x_tile = x_ref[...]        # (B, tk): streamed per k step

    # x streams in f32; cast to A_T's (bf16) dtype right before the MXU dot.
    acc_ref[...] += jnp.dot(
        x_tile.astype(at_ref.dtype), at_ref[...],
        preferred_element_type=jnp.float32)

    @pl.when(k == pl.num_programs(1) - 1)
    def _epilogue():
        r = acc_ref[...]                                       # (B, tm) residual
        part = 0.5 * jnp.sum(r * r, axis=-1, keepdims=True)    # (B, 1)
        out_ref[...] = part[None].astype(out_ref.dtype)        # (1, B, 1) block


# -------------------------------------------------------------------------- forward


def data_fidelity_forward(x, y, op: PreparedOperator):
    """f(x, y) = 0.5 * || A @ vec(x_b) - y_b ||^2 per batch element, as (B,) f32.

    x:  (B, ...)  image batch, trailing dims flatten to N = op.n.
    y:  (B, M)    measurements, M = op.m.
    op: PreparedOperator from prepare_operator() (built once outside the hot path).
    """
    B = x.shape[0]
    N = math.prod(x.shape[1:])
    M = y.shape[1]
    assert (N, M) == (op.n, op.m), ((N, M), (op.n, op.m))
    n_padded = op.tk * op.num_k
    m_padded = op.tm * op.num_m
    assert op.a_t.shape == (n_padded, m_padded), (op.a_t.shape, n_padded, m_padded)

    # Per-call glue is O(B*N + B*M) only; A_T is already padded/cast.
    x_flat = x.reshape(B, N).astype(jnp.float32)
    if n_padded != N:
        x_flat = jnp.pad(x_flat, ((0, 0), (0, n_padded - N)))
    y_f = y.astype(jnp.float32)
    if m_padded != M:
        y_f = jnp.pad(y_f, ((0, 0), (0, m_padded - M)))

    x_bytes = B * n_padded * 4
    x_resident = x_bytes <= (8 << 20)

    if x_resident:
        # (num_k, B, tk): constant block index -> DMA'd once, indexed by k in-kernel.
        x_in = x_flat.reshape(B, op.num_k, op.tk).transpose(1, 0, 2)
        x_spec = pl.BlockSpec((op.num_k, B, op.tk), lambda m, k: (0, 0, 0))
        x_vmem = 2 * x_bytes
    else:
        x_in = x_flat
        x_spec = pl.BlockSpec((B, op.tk), lambda m, k: (0, k))
        x_vmem = 2 * B * op.tk * 4

    itemsize = jnp.dtype(op.a_t.dtype).itemsize
    vmem_need = (2 * op.tk * op.tm * itemsize    # A_T tiles, double-buffered
                 + 2 * B * op.tm * 4             # y tile (f32)
                 + x_vmem                        # x
                 + B * op.tm * 4                 # f32 accumulator scratch
                 + 2 * B * 4                     # output block
                 + (2 << 20))                    # slack
    vmem_limit = int(min(max(int(1.25 * vmem_need), 16 << 20), op.vmem_budget))

    kernel = functools.partial(_data_fidelity_kernel, x_resident=x_resident)

    partial_sums = pl.pallas_call(
        kernel,
        out_shape=jax.ShapeDtypeStruct((op.num_m, B, 1), jnp.float32),
        grid_spec=pltpu.PrefetchScalarGridSpec(
            num_scalar_prefetch=0,
            grid=(op.num_m, op.num_k),           # reduction (N) axis last
            in_specs=[
                x_spec,
                pl.BlockSpec((op.tk, op.tm), lambda m, k: (k, m)),   # A_T tile
                pl.BlockSpec((B, op.tm), lambda m, k: (0, m)),       # y (k-resident)
            ],
            out_specs=pl.BlockSpec((1, B, 1), lambda m, k: (m, 0, 0)),
            scratch_shapes=[pltpu.VMEM((B, op.tm), jnp.float32)],
        ),
        compiler_params=pltpu.CompilerParams(
            dimension_semantics=("parallel", "arbitrary"),
            vmem_limit_bytes=vmem_limit,
        ),
    )(x_in, op.a_t, y_f)

    # Tiny cross-M-tile reduction of the partial sums: (num_m, B, 1) -> (B,).
    return jnp.sum(partial_sums[:, :, 0], axis=0)


# ------------------------------------------------------------------------- reference


def data_fidelity_reference(x, y, a_matrix):
    """Pure-JAX reference: 0.5 * ||A @ vec(x) - y||^2 per batch row (f32)."""
    B = x.shape[0]
    x_flat = x.reshape(B, -1).astype(jnp.float32)
    u = jnp.einsum("bn,mn->bm", x_flat, a_matrix,
                   precision=jax.lax.Precision.HIGHEST)
    return 0.5 * jnp.sum((u - y) ** 2, axis=-1)


# ------------------------------------------------------------------------------ main


if __name__ == "__main__":
    key = jax.random.PRNGKey(0)

    # --- Case 1: aligned shapes (B=4, C=4, 16x16 -> N=1024, M=256) ----------------
    B, C, H, W = 4, 4, 16, 16
    N = C * H * W
    M = 256
    kx, ky, ka = jax.random.split(key, 3)
    x = jax.random.normal(kx, (B, C, H, W), dtype=jnp.float32)
    y = jax.random.normal(ky, (B, M), dtype=jnp.float32)
    a_matrix = jax.random.normal(ka, (M, N), dtype=jnp.float32) * 0.05

    # Operator prepared ONCE outside the hot path (transpose + pad + cast).
    op_bf16 = prepare_operator(a_matrix, compute_dtype=jnp.bfloat16, batch_hint=B)
    op_f32 = prepare_operator(a_matrix, compute_dtype=jnp.float32, batch_hint=B)

    ref = data_fidelity_reference(x, y, a_matrix)

    out_bf16 = jax.block_until_ready(data_fidelity_forward(x, y, op_bf16))
    assert out_bf16.shape == (B,)
    assert jnp.allclose(out_bf16, ref, rtol=2e-2, atol=0.5), (out_bf16, ref)

    out_f32 = jax.block_until_ready(data_fidelity_forward(x, y, op_f32))
    assert jnp.allclose(out_f32, ref, rtol=5e-3, atol=0.5), (out_f32, ref)

    # --- Case 2: non-multiple shapes exercise padding/rounding (N=1200, M=160) ----
    B2, C2, H2, W2 = 2, 3, 20, 20
    N2 = C2 * H2 * W2
    M2 = 160
    kx2, ky2, ka2 = jax.random.split(jax.random.PRNGKey(1), 3)
    x2 = jax.random.normal(kx2, (B2, C2, H2, W2), dtype=jnp.float32)
    y2 = jax.random.normal(ky2, (B2, M2), dtype=jnp.float32)
    a2 = jax.random.normal(ka2, (M2, N2), dtype=jnp.float32) * 0.05

    op2 = prepare_operator(a2, compute_dtype=jnp.bfloat16, batch_hint=B2)
    ref2 = data_fidelity_reference(x2, y2, a2)
    out2 = jax.block_until_ready(data_fidelity_forward(x2, y2, op2))
    assert out2.shape == (B2,)
    assert jnp.allclose(out2, ref2, rtol=2e-2, atol=0.5), (out2, ref2)

    print("KERNEL_OK")
</pallas_src>

<mosaic_0001>
module attributes {stable_mosaic.version = 11 : i64} {
  func.func @_data_fidelity_kernel(%arg0: i32, %arg1: i32, %arg2: memref<1x4x1024xf32, #tpu.memory_space<vmem>>, %arg3: memref<1024x256xbf16, #tpu.memory_space<vmem>>, %arg4: memref<4x256xf32, #tpu.memory_space<vmem>>, %arg5: memref<1x4x1xf32, #tpu.memory_space<vmem>>, %arg6: memref<4x256xf32, #tpu.memory_space<vmem>>) attributes {dimension_semantics = [#tpu.dimension_semantics<parallel>, #tpu.dimension_semantics<arbitrary>], iteration_bounds = array<i64: 1, 1>, scalar_prefetch = 0 : i64, scratch_operands = 1 : i64, tpu.core_type = #tpu.core_type<tc>, window_params = [{pipeline_mode = #tpu.pipeline_mode<synchronous>, transform_indices = @transform_0, window_bounds = array<i64: 1, 4, 1024>}, {transform_indices = @transform_1, window_bounds = array<i64: 1024, 256>}, {transform_indices = @transform_2, window_bounds = array<i64: 4, 256>}, {transform_indices = @transform_3, window_bounds = array<i64: 1, 4, 1>}]} {
    %c0_i32 = arith.constant 0 : i32
    %0 = arith.cmpi eq, %arg1, %c0_i32 : i32
    %1 = arith.extui %0 : i1 to i32
    %c0_i32_0 = arith.constant 0 : i32
    %2 = arith.cmpi ne, %1, %c0_i32_0 : i32
    scf.if %2 {
      %c0_10 = arith.constant 0 : index
      %c0_11 = arith.constant 0 : index
      %15 = vector.load %arg4[%c0_10, %c0_11] : memref<4x256xf32, #tpu.memory_space<vmem>>, vector<4x256xf32>
      %cst_12 = arith.constant 0.000000e+00 : f32
      %16 = vector.broadcast %cst_12 : f32 to vector<4x256xf32>
      %17 = arith.subf %16, %15 : vector<4x256xf32>
      %c0_13 = arith.constant 0 : index
      %c0_14 = arith.constant 0 : index
      %18 = vector.load %arg6[%c0_13, %c0_14] : memref<4x256xf32, #tpu.memory_space<vmem>>, vector<4x256xf32>
      tpu.vector_store %arg6[%c0_13, %c0_14], %17 {strides = array<i32>} : memref<4x256xf32, #tpu.memory_space<vmem>>, vector<4x256xf32>,
    } else {
    }
    %3 = arith.index_cast %arg1 : i32 to index
    %c0 = arith.constant 0 : index
    %c0_1 = arith.constant 0 : index
    %4 = vector.load %arg2[%3, %c0, %c0_1] : memref<1x4x1024xf32, #tpu.memory_space<vmem>>, vector<1x4x1024xf32>
    %5 = vector.shape_cast %4 : vector<1x4x1024xf32> to vector<4x1024xf32>
    %c0_2 = arith.constant 0 : index
    %c0_3 = arith.constant 0 : index
    %6 = vector.load %arg6[%c0_2, %c0_3] : memref<4x256xf32, #tpu.memory_space<vmem>>, vector<4x256xf32>
    %7 = arith.truncf %5 : vector<4x1024xf32> to vector<4x1024xbf16>
    %c0_4 = arith.constant 0 : index
    %c0_5 = arith.constant 0 : index
    %8 = vector.load %arg3[%c0_4, %c0_5] : memref<1024x256xbf16, #tpu.memory_space<vmem>>, vector<1024x256xbf16>
    %cst = arith.constant dense<0.000000e+00> : vector<4x256xf32>
    %9 = tpu.matmul %7, %8, %cst {dimension_numbers = #tpu.dot_dimension_numbers<[1], [0], [0], [1], [0, 0, 1, 1], [], []>} : vector<4x1024xbf16>, vector<1024x256xbf16>, vector<4x256xf32> -> vector<4x256xf32>
    %10 = arith.addf %6, %9 : vector<4x256xf32>
    %c0_6 = arith.constant 0 : index
    %c0_7 = arith.constant 0 : index
    %11 = vector.load %arg6[%c0_6, %c0_7] : memref<4x256xf32, #tpu.memory_space<vmem>>, vector<4x256xf32>
    tpu.vector_store %arg6[%c0_6, %c0_7], %10 {strides = array<i32>} : memref<4x256xf32, #tpu.memory_space<vmem>>, vector<4x256xf32>,
    %c0_i32_8 = arith.constant 0 : i32
    %12 = arith.cmpi eq, %arg1, %c0_i32_8 : i32
    %13 = arith.extui %12 : i1 to i32
    %c0_i32_9 = arith.constant 0 : i32
    %14 = arith.cmpi ne, %13, %c0_i32_9 : i32
    scf.if %14 {
      %c0_10 = arith.constant 0 : index
      %c0_11 = arith.constant 0 : index
      %15 = vector.load %arg6[%c0_10, %c0_11] : memref<4x256xf32, #tpu.memory_space<vmem>>, vector<4x256xf32>
      %16 = arith.mulf %15, %15 : vector<4x256xf32>
      %cst_12 = arith.constant dense<0.000000e+00> : vector<4xf32>
      %17 = vector.multi_reduction <add>, %16, %cst_12 [1] : vector<4x256xf32> to vector<4xf32>
      %18 = vector.shape_cast %17 : vector<4xf32> to vector<4x1xf32>
      %cst_13 = arith.constant 5.000000e-01 : f32
      %19 = vector.broadcast %cst_13 : f32 to vector<4x1xf32>
      %20 = arith.mulf %19, %18 : vector<4x1xf32>
      %21 = vector.shape_cast %20 : vector<4x1xf32> to vector<1x4x1xf32>
      %c0_14 = arith.constant 0 : index
      %c0_15 = arith.constant 0 : index
      %c0_16 = arith.constant 0 : index
      %22 = vector.load %arg5[%c0_14, %c0_15, %c0_16] : memref<1x4x1xf32, #tpu.memory_space<vmem>>, vector<1x4x1xf32>
      tpu.vector_store %arg5[%c0_14, %c0_15, %c0_16], %21 {strides = array<i32>} : memref<1x4x1xf32, #tpu.memory_space<vmem>>, vector<1x4x1xf32>,
    } else {
    }
    return
  }
  func.func @transform_0(%arg0: i32, %arg1: i32) -> (i32, i32, i32) {
    %c0_i32 = arith.constant 0 : i32
    %c0_i32_0 = arith.constant 0 : i32
    %c0_i32_1 = arith.constant 0 : i32
    %c0_i32_2 = arith.constant 0 : i32
    return %c0_i32, %c0_i32_0, %c0_i32_1 : i32, i32, i32
  }
  func.func @transform_1(%arg0: i32, %arg1: i32) -> (i32, i32) {
    %c0_i32 = arith.constant 0 : i32
    return %arg1, %arg0 : i32, i32
  }
  func.func @transform_2(%arg0: i32, %arg1: i32) -> (i32, i32) {
    %c0_i32 = arith.constant 0 : i32
    %c0_i32_0 = arith.constant 0 : i32
    return %c0_i32, %arg0 : i32, i32
  }
  func.func @transform_3(%arg0: i32, %arg1: i32) -> (i32, i32, i32) {
    %c0_i32 = arith.constant 0 : i32
    %c0_i32_0 = arith.constant 0 : i32
    %c0_i32_1 = arith.constant 0 : i32
    return %arg0, %c0_i32, %c0_i32_0 : i32, i32, i32
  }
}

</mosaic_0001>

<bundles_post_ra>
// kernel: tpu_custom_call.1
= control target key start
LH: loop header
LB: loop body
LE: loop exit
PB: predicated region body
PF: predicated region fallthrough
CT: control target
= control target key end

     0   :  { %8 = vsyncpa [#allocation4], 0  ;;  %s1489_s0 = inlined_call_operand.hbm [shape: f32[1,4,1024], index: 0, kind: input, shape index: {}]   ;;  %s1490_s1 = inlined_call_operand.hbm [shape: bf16[1024,256], index: 1, kind: input, shape index: {}]   ;;  %s1491_s2 = inlined_call_operand.hbm [shape: f32[4,256], index: 2, kind: input, shape index: {}]   ;;  %s1492_s3 = inlined_call_operand.vmem [shape: f32[1,4,1], index: 3, kind: output, shape index: {}]  }
   0x1   :  { %9 = vsyncpa [#allocation6], 0  ;;  %s1440_s12 = smov [#allocation5]  }
   0x2   :  { %s25_s13 = sshll.u32 %s1440_s12, 4  ;;  %s26_s13 = int_to_ptr.vmem [resolvable:$true] %s25_s13 }
   0x3   :  { %s1384_s14 = scalar_lea.vmem %s26_s13, 16384  ;;  %p1389_p1 = scmp.lt.s32.totalorder %s26_s13, %s26_s13 }
   0x4   :  { %p1385_p0 = scmp.ne.s32.totalorder %s26_s13, %s1384_s14  ;;  %p1390_p2 = scmp.lt.s32.totalorder %s1384_s14, %s1384_s14 }
   0x6   :  { %p1391_p3 = por %p1390_p2, %p1389_p1 }
   0x8   :  { %p1392_p4 = pnand %p1391_p3, %p1385_p0 }
   0xa   :  { %1395 = shalt.err (!%p1392_p4)
}
   0xb   :  { %s1441_s15 = smov 128   ;;  %s1442_s16 = smov 8  }
   0xc   :  { %31 = dma.hbm_to_vmem [thread:$0]  %s1490_s1, 16384, %s26_s13, [#allocation6], %s1441_s15, %s1441_s15, %s1442_s16  }
   0xd   :  { %s1443_s19 = smov [#allocation3]   ;;  %s1444_s21 = smov [#allocation7]  }
   0xe   :  { %s16_s20 = sshll.u32 %s1443_s19, 4  ;;  %s38_s22 = sshll.u32 %s1444_s21, 4  ;;  %s17_s20 = int_to_ptr.vmem [resolvable:$true] %s16_s20  ;;  %s39_s22 = int_to_ptr.vmem [resolvable:$true] %s38_s22 }
   0xf   :  { %s1404_s23 = scalar_lea.vmem %s17_s20, 512  ;;  %p1409_p6 = scmp.lt.s32.totalorder %s17_s20, %s17_s20 }
  0x10   :  { %p1405_p5 = scmp.ne.s32.totalorder %s17_s20, %s1404_s23  ;;  %p1410_p7 = scmp.lt.s32.totalorder %s1404_s23, %s1404_s23 }
  0x12   :  { %p1411_p8 = por %p1410_p7, %p1409_p6 }
  0x14   :  { %p1412_p9 = pnand %p1411_p8, %p1405_p5 }
  0x16   :  { %1415 = shalt.err (!%p1412_p9)
}
  0x17   :  { %19 = dma.hbm_to_vmem [thread:$0]  %s1489_s0, 512, %s17_s20, [#allocation4]  }
  0x18   :  { %s1424_s26 = scalar_lea.vmem %s39_s22, 128  ;;  %p1429_p11 = scmp.lt.s32.totalorder %s39_s22, %s39_s22 }
  0x19   :  { %p1425_p10 = scmp.ne.s32.totalorder %s39_s22, %s1424_s26  ;;  %p1430_p12 = scmp.lt.s32.totalorder %s1424_s26, %s1424_s26 }
  0x1b   :  { %p1431_p13 = por %p1430_p12, %p1429_p11 }
  0x1d   :  { %p1432_p0 = pnand %p1431_p13, %p1425_p10 }
  0x1f   :  { %1435 = shalt.err (!%p1432_p0)
}
  0x20   :  { %41 = dma.hbm_to_vmem [thread:$0]  %s1491_s2, 128, %s39_s22, [#allocation6]  }
  0x21   :  { %1436 = dma.done.wait [#allocation4], 512  }
  0x22   :  { %1437 = vsyncadd [#allocation4], 4294966784 }
  0x23   :  { %1438 = dma.done.wait [#allocation6], 16512  }
  0x24   :  { %1439 = vsyncadd [#allocation6], 4294950784  ;;  %v1180_v0 = vld [vmem:[#allocation5 + $0x74] ss:$8 sps:$4 sm:$0xff]   ;;  %v1184_v2 = vld [vmem:[#allocation5 + $0x70] ss:$8 sps:$4 sm:$0xff]  }
  0x25   :  { %v1182_v1 = vld [vmem:[#allocation5 + $0x174] ss:$8 sps:$4 sm:$0xff]   ;;  %854 = vmatprep.subr.bf16.mxu0 %v1180_v0  ;;  %v1185_v3 = vld [vmem:[#allocation5 + $0x170] ss:$8 sps:$4 sm:$0xff]   ;;  %v1186_v4 = vld [vmem:[#allocation5 + $0x64] ss:$8 sps:$4 sm:$0xff]  }
  0x26   :  { %895 = vmatprep.subr.bf16.mxu1 %v1182_v1  ;;  %855 = vmatpush1.bf16.msra.mxu0 %v1184_v2  ;;  %v1188_v5 = vld [vmem:[#allocation5 + $0x164] ss:$8 sps:$4 sm:$0xff]   ;;  %v1190_v6 = vld [vmem:[#allocation5 + $0x60] ss:$8 sps:$4 sm:$0xff]   ;;  %v1192_v8 = vld [vmem:[#allocation5 + $0x54] ss:$8 sps:$4 sm:$0xff]  }
  0x27   :  { %896 = vmatpush1.bf16.msra.mxu1 %v1185_v3  ;;  %856 = vmatprep.subr.bf16.mxu0 %v1186_v4  ;;  %v1191_v7 = vld [vmem:[#allocation5 + $0x160] ss:$8 sps:$4 sm:$0xff]   ;;  %v1194_v9 = vld [vmem:[#allocation5 + $0x154] ss:$8 sps:$4 sm:$0xff]   ;;  %v1196_v10 = vld [vmem:[#allocation5 + $0x50] ss:$8 sps:$4 sm:$0xff]  }
  0x28   :  { %897 = vmatprep.subr.bf16.mxu1 %v1188_v5  ;;  %v1197_v11 = vld [vmem:[#allocation5 + $0x150] ss:$8 sps:$4 sm:$0xff]   ;;  %v1198_v12 = vld [vmem:[#allocation5 + $0x44] ss:$8 sps:$4 sm:$0xff]   ;;  %v1202_v14 = vld [vmem:[#allocation5 + $0x40] ss:$8 sps:$4 sm:$0xff]  }
  0x29   :  { %v1200_v13 = vld [vmem:[#allocation5 + $0x144] ss:$8 sps:$4 sm:$0xff]   ;;  %v1203_v15 = vld [vmem:[#allocation5 + $0x140] ss:$8 sps:$4 sm:$0xff]   ;;  %v1204_v16 = vld [vmem:[#allocation5 + $0x34] ss:$8 sps:$4 sm:$0xff]  }
  0x2a   :  { %857 = vmatpush1.bf16.msra.mxu0 %v1190_v6  ;;  %v1206_v17 = vld [vmem:[#allocation5 + $0x134] ss:$8 sps:$4 sm:$0xff]   ;;  %v1208_v18 = vld [vmem:[#allocation5 + $0x30] ss:$8 sps:$4 sm:$0xff]   ;;  %v1210_v20 = vld [vmem:[#allocation5 + $0x24] ss:$8 sps:$4 sm:$0xff]  }
  0x2b   :  { %898 = vmatpush1.bf16.msra.mxu1 %v1191_v7  ;;  %858 = vmatprep.subr.bf16.mxu0 %v1192_v8  ;;  %v1209_v19 = vld [vmem:[#allocation5 + $0x130] ss:$8 sps:$4 sm:$0xff]   ;;  %v1212_v21 = vld [vmem:[#allocation5 + $0x124] ss:$8 sps:$4 sm:$0xff]   ;;  %v1214_v22 = vld [vmem:[#allocation5 + $0x20] ss:$8 sps:$4 sm:$0xff]  }
  0x2c   :  { %899 = vmatprep.subr.bf16.mxu1 %v1194_v9  ;;  %v1215_v23 = vld [vmem:[#allocation5 + $0x120] ss:$8 sps:$4 sm:$0xff]   ;;  %v1216_v24 = vld [vmem:[#allocation5 + $0x14] ss:$8 sps:$4 sm:$0xff]   ;;  %v1220_v26 = vld [vmem:[#allocation5 + $0x10] ss:$8 sps:$4 sm:$0xff]  }
  0x2d   :  { %v1218_v25 = vld [vmem:[#allocation5 + $0x114] ss:$8 sps:$4 sm:$0xff]   ;;  %v1221_v27 = vld [vmem:[#allocation5 + $0x110] ss:$8 sps:$4 sm:$0xff]   ;;  %v1222_v28 = vld [vmem:[#allocation5 + $0x4] ss:$8 sps:$4 sm:$0xff]  }
  0x2e   :  { %859 = vmatpush1.bf16.msra.mxu0 %v1196_v10  ;;  %v1224_v29 = vld [vmem:[#allocation5 + $0x104] ss:$8 sps:$4 sm:$0xff]   ;;  %v1226_v30 = vld [vmem:[#allocation5] ss:$8 sps:$4 sm:$0xff]   ;;  %v1228_v32 = vld [vmem:[#allocation5 + $0xf4] ss:$8 sps:$4 sm:$0xff]  }
  0x2f   :  { %900 = vmatpush1.bf16.msra.mxu1 %v1197_v11  ;;  %860 = vmatprep.subr.bf16.mxu0 %v1198_v12  ;;  %v1227_v31 = vld [vmem:[#allocation5 + $0x100] ss:$8 sps:$4 sm:$0xff]   ;;  %v1230_v33 = vld [vmem:[#allocation5 + $0x1f4] ss:$8 sps:$4 sm:$0xff]   ;;  %v1232_v34 = vld [vmem:[#allocation5 + $0xf0] ss:$8 sps:$4 sm:$0xff]  }
  0x30   :  { %901 = vmatprep.subr.bf16.mxu1 %v1200_v13  ;;  %v1233_v35 = vld [vmem:[#allocation5 + $0x1f0] ss:$8 sps:$4 sm:$0xff]   ;;  %v1234_v36 = vld [vmem:[#allocation5 + $0xe4] ss:$8 sps:$4 sm:$0xff]   ;;  %v1238_v38 = vld [vmem:[#allocation5 + $0xe0] ss:$8 sps:$4 sm:$0xff]  }
  0x31   :  { %v1236_v37 = vld [vmem:[#allocation5 + $0x1e4] ss:$8 sps:$4 sm:$0xff]   ;;  %v1239_v39 = vld [vmem:[#allocation5 + $0x1e0] ss:$8 sps:$4 sm:$0xff]   ;;  %v1240_v40 = vld [vmem:[#allocation5 + $0xd4] ss:$8 sps:$4 sm:$0xff]  }
  0x32   :  { %861 = vmatpush1.bf16.msra.mxu0 %v1202_v14  ;;  %v1242_v41 = vld [vmem:[#allocation5 + $0x1d4] ss:$8 sps:$4 sm:$0xff]   ;;  %v1244_v42 = vld [vmem:[#allocation5 + $0xd0] ss:$8 sps:$4 sm:$0xff]   ;;  %v1246_v44 = vld [vmem:[#allocation5 + $0xc4] ss:$8 sps:$4 sm:$0xff]  }
  0x33   :  { %902 = vmatpush1.bf16.msra.mxu1 %v1203_v15  ;;  %862 = vmatprep.subr.bf16.mxu0 %v1204_v16  ;;  %v1245_v43 = vld [vmem:[#allocation5 + $0x1d0] ss:$8 sps:$4 sm:$0xff]   ;;  %v1248_v45 = vld [vmem:[#allocation5 + $0x1c4] ss:$8 sps:$4 sm:$0xff]   ;;  %v1250_v49 = vld [vmem:[#allocation5 + $0xc0] ss:$8 sps:$4 sm:$0xff]  }
  0x34   :  { %903 = vmatprep.subr.bf16.mxu1 %v1206_v17  ;;  %v61_v46 = vld [vmem:[#allocation3] sm:$0xff]  ;;  %v62_v48 = vld [vmem:[#allocation3 + $0x8] sm:$0xff]  ;;  %v1252_v52 = vld [vmem:[#allocation5 + $0xb4] ss:$8 sps:$4 sm:$0xff]   ;;  %vm1032_vm0 = vcmask 1043456   ;;  %vm1039_vm1 = vcmask 3072  }
  0x35   :  { %v70_v47 = vcombine.high %v61_v46, %v61_v46  ;;  %v1251_v50 = vld [vmem:[#allocation5 + $0x1c0] ss:$8 sps:$4 sm:$0xff]   ;;  %v71_v51 = vcombine.high %v62_v48, %v62_v48  ;;  %v1254_v53 = vld [vmem:[#allocation5 + $0x1b4] ss:$8 sps:$4 sm:$0xff]   ;;  %v1256_v56 = vld [vmem:[#allocation5 + $0xb0] ss:$8 sps:$4 sm:$0xff]   ;;  %v78_v8 = vpack.c.bf16 %v61_v46, %v61_v46  ;;  %v80_v9 = vpack.c.bf16 %v62_v48, %v62_v48 }
  0x36   :  { %863 = vmatpush1.bf16.msra.mxu0 %v1208_v18  ;;  %v1257_v57 = vld [vmem:[#allocation5 + $0x1b0] ss:$8 sps:$4 sm:$0xff]   ;;  %v1258_v58 = vld [vmem:[#allocation5 + $0xa4] ss:$8 sps:$4 sm:$0xff]   ;;  %v1262_v60 = vld [vmem:[#allocation5 + $0xa0] ss:$8 sps:$4 sm:$0xff]  }
  0x37   :  { %904 = vmatpush1.bf16.msra.mxu1 %v1209_v19  ;;  %864 = vmatprep.subr.bf16.mxu0 %v1210_v20  ;;  %v79_v54 = vpack.c.bf16 %v70_v47, %v70_v47  ;;  %v81_v55 = vpack.c.bf16 %v71_v51, %v71_v51  ;;  %v1260_v59 = vld [vmem:[#allocation5 + $0x1a4] ss:$8 sps:$4 sm:$0xff]   ;;  %v1263_v61 = vld [vmem:[#allocation5 + $0x1a0] ss:$8 sps:$4 sm:$0xff]   ;;  %v1264_v62 = vld [vmem:[#allocation5 + $0x94] ss:$8 sps:$4 sm:$0xff]  }
  0x38   :  { %905 = vmatprep.subr.bf16.mxu1 %v1212_v21  ;;  %v1266_v63 = vld [vmem:[#allocation5 + $0x194] ss:$8 sps:$4 sm:$0xff]   ;;  %v1268_v0 = vld [vmem:[#allocation5 + $0x90] ss:$8 sps:$4 sm:$0xff]   ;;  %v1270_v2 = vld [vmem:[#allocation5 + $0x84] ss:$8 sps:$4 sm:$0xff]  }
  0x39   :  { %886 = vmatprep.mubr.bf16.mxu0 %v79_v54  ;;  %927 = vmatprep.mubr.bf16.mxu1 %v81_v55  ;;  %v1269_v1 = vld [vmem:[#allocation5 + $0x190] ss:$8 sps:$4 sm:$0xff]   ;;  %v1272_v3 = vld [vmem:[#allocation5 + $0x184] ss:$8 sps:$4 sm:$0xff]   ;;  %v1274_v4 = vld [vmem:[#allocation5 + $0x80] ss:$8 sps:$4 sm:$0xff]  }
  0x3a   :  { %865 = vmatpush1.bf16.msra.mxu0 %v1214_v22  ;;  %v1275_v5 = vld [vmem:[#allocation5 + $0x180] ss:$8 sps:$4 sm:$0xff]   ;;  %v1280_v6 = vld [vmem:[#allocation5 + $0x274] ss:$8 sps:$4 sm:$0xff]   ;;  %v1278_v10 = vld [vmem:[#allocation5 + $0x270] ss:$8 sps:$4 sm:$0xff]  }
  0x3b   :  { %906 = vmatpush1.bf16.msra.mxu1 %v1215_v23  ;;  %866 = vmatprep.subr.bf16.mxu0 %v1216_v24  ;;  %v1283_v7 = vld [vmem:[#allocation5 + $0x374] ss:$8 sps:$4 sm:$0xff]   ;;  %v1281_v11 = vld [vmem:[#allocation5 + $0x370] ss:$8 sps:$4 sm:$0xff]   ;;  %v1286_v12 = vld [vmem:[#allocation5 + $0x264] ss:$8 sps:$4 sm:$0xff]  }
  0x3c   :  { %907 = vmatprep.subr.bf16.mxu1 %v1218_v25  ;;  %v1289_v13 = vld [vmem:[#allocation5 + $0x364] ss:$8 sps:$4 sm:$0xff]   ;;  %v1284_v14 = vld [vmem:[#allocation5 + $0x260] ss:$8 sps:$4 sm:$0xff]   ;;  %v1292_v16 = vld [vmem:[#allocation5 + $0x254] ss:$8 sps:$4 sm:$0xff]  }
  0x3d   :  { %v1287_v15 = vld [vmem:[#allocation5 + $0x360] ss:$8 sps:$4 sm:$0xff]   ;;  %v1295_v17 = vld [vmem:[#allocation5 + $0x354] ss:$8 sps:$4 sm:$0xff]   ;;  %v1290_v18 = vld [vmem:[#allocation5 + $0x250] ss:$8 sps:$4 sm:$0xff]  }
  0x3e   :  { %867 = vmatpush1.bf16.msra.mxu0 %v1220_v26  ;;  %v1293_v19 = vld [vmem:[#allocation5 + $0x350] ss:$8 sps:$4 sm:$0xff]   ;;  %v1298_v20 = vld [vmem:[#allocation5 + $0x244] ss:$8 sps:$4 sm:$0xff]   ;;  %v1296_v22 = vld [vmem:[#allocation5 + $0x240] ss:$8 sps:$4 sm:$0xff]  }
  0x3f   :  { %908 = vmatpush1.bf16.msra.mxu1 %v1221_v27  ;;  %868 = vmatprep.subr.bf16.mxu0 %v1222_v28  ;;  %v1301_v21 = vld [vmem:[#allocation5 + $0x344] ss:$8 sps:$4 sm:$0xff]   ;;  %v1299_v23 = vld [vmem:[#allocation5 + $0x340] ss:$8 sps:$4 sm:$0xff]   ;;  %v1304_v24 = vld [vmem:[#allocation5 + $0x234] ss:$8 sps:$4 sm:$0xff]  }
  0x40   :  { %909 = vmatprep.subr.bf16.mxu1 %v1224_v29  ;;  %v1307_v25 = vld [vmem:[#allocation5 + $0x334] ss:$8 sps:$4 sm:$0xff]   ;;  %v1302_v26 = vld [vmem:[#allocation5 + $0x230] ss:$8 sps:$4 sm:$0xff]   ;;  %v1310_v28 = vld [vmem:[#allocation5 + $0x224] ss:$8 sps:$4 sm:$0xff]  }
  0x41   :  { %v1305_v27 = vld [vmem:[#allocation5 + $0x330] ss:$8 sps:$4 sm:$0xff]   ;;  %v1313_v29 = vld [vmem:[#allocation5 + $0x324] ss:$8 sps:$4 sm:$0xff]   ;;  %v1328_v46 = vld [vmem:[#allocation5 + $0x2f4] ss:$8 sps:$4 sm:$0xff]  }
  0x42   :  { %869 = vmatpush1.bf16.msra.mxu0 %v1226_v30  ;;  %v1308_v30 = vld [vmem:[#allocation5 + $0x220] ss:$8 sps:$4 sm:$0xff]   ;;  %v1331_v47 = vld [vmem:[#allocation5 + $0x3f4] ss:$8 sps:$4 sm:$0xff]   ;;  %v1326_v48 = vld [vmem:[#allocation5 + $0x2f0] ss:$8 sps:$4 sm:$0xff]  }
  0x43   :  { %910 = vmatpush1.bf16.msra.mxu1 %v1227_v31  ;;  %870 = vmatprep.subr.bf16.mxu0 %v1228_v32  ;;  %v1311_v31 = vld [vmem:[#allocation5 + $0x320] ss:$8 sps:$4 sm:$0xff]   ;;  %v1316_v32 = vld [vmem:[#allocation5 + $0x214] ss:$8 sps:$4 sm:$0xff]   ;;  %v1337_v51 = vld [vmem:[#allocation5 + $0x3e4] ss:$8 sps:$4 sm:$0xff]  }
  0x44   :  { %911 = vmatprep.subr.bf16.mxu1 %v1230_v33  ;;  %v1319_v33 = vld [vmem:[#allocation5 + $0x314] ss:$8 sps:$4 sm:$0xff]  }
  0x45   :  { %v1340_v54 = vld [vmem:[#allocation5 + $0x2d4] ss:$8 sps:$4 sm:$0xff]  }
  0x46   :  { %871 = vmatpush2.bf16.msra.mxu0 %v1232_v34  ;;  %v1474_v34 = vld [vmem:[#allocation3 + $0x10] sm:$0xff] }
  0x47   :  { %912 = vmatpush2.bf16.msra.mxu1 %v1233_v35  ;;  %872 = vmatprep.subr.bf16.mxu0 %v1234_v36  ;;  %v1476_v35 = vld [vmem:[#allocation3 + $0x18] sm:$0xff]  ;;  %v72_v36 = vcombine.high %v1474_v34, %v1474_v34 }
  0x48   :  { %913 = vmatprep.subr.bf16.mxu1 %v1236_v37  ;;  %v73_v37 = vcombine.high %v1476_v35, %v1476_v35  ;;  %v1343_v55 = vld [vmem:[#allocation5 + $0x3d4] ss:$8 sps:$4 sm:$0xff]  }
  0x4a   :  { %873 = vmatpush2.bf16.msra.mxu0 %v1238_v38  ;;  %v1314_v38 = vld [vmem:[#allocation5 + $0x210] ss:$8 sps:$4 sm:$0xff]  }
  0x4b   :  { %914 = vmatpush2.bf16.msra.mxu1 %v1239_v39  ;;  %874 = vmatprep.subr.bf16.mxu0 %v1240_v40  ;;  %v1317_v39 = vld [vmem:[#allocation5 + $0x310] ss:$8 sps:$4 sm:$0xff]   ;;  %v1322_v40 = vld [vmem:[#allocation5 + $0x204] ss:$8 sps:$4 sm:$0xff]  }
  0x4c   :  { %915 = vmatprep.subr.bf16.mxu1 %v1242_v41  ;;  %v1325_v41 = vld [vmem:[#allocation5 + $0x304] ss:$8 sps:$4 sm:$0xff]  }
  0x4e   :  { %875 = vmatpush2.bf16.msra.mxu0 %v1244_v42  ;;  %v83_v42 = vpack.c.bf16 %v72_v36, %v72_v36 }
  0x4f   :  { %916 = vmatpush2.bf16.msra.mxu1 %v1245_v43  ;;  %876 = vmatprep.subr.bf16.mxu0 %v1246_v44  ;;  %v85_v43 = vpack.c.bf16 %v73_v37, %v73_v37  ;;  %v1320_v44 = vld [vmem:[#allocation5 + $0x200] ss:$8 sps:$4 sm:$0xff]  }
  0x50   :  { %917 = vmatprep.subr.bf16.mxu1 %v1248_v45  ;;  %v1323_v45 = vld [vmem:[#allocation5 + $0x300] ss:$8 sps:$4 sm:$0xff]  }
  0x52   :  { %877 = vmatpush2.bf16.msra.mxu0 %v1250_v49  ;;  %v1329_v49 = vld [vmem:[#allocation5 + $0x3f0] ss:$8 sps:$4 sm:$0xff]  }
  0x53   :  { %918 = vmatpush2.bf16.msra.mxu1 %v1251_v50  ;;  %878 = vmatprep.subr.bf16.mxu0 %v1252_v52  ;;  %v1334_v50 = vld [vmem:[#allocation5 + $0x2e4] ss:$8 sps:$4 sm:$0xff]   ;;  %v1332_v52 = vld [vmem:[#allocation5 + $0x2e0] ss:$8 sps:$4 sm:$0xff]  }
  0x54   :  { %919 = vmatprep.subr.bf16.mxu1 %v1254_v53  ;;  %v1335_v53 = vld [vmem:[#allocation5 + $0x3e0] ss:$8 sps:$4 sm:$0xff]  }
  0x56   :  { %879 = vmatpush2.bf16.msra.mxu0 %v1256_v56  ;;  %v1338_v56 = vld [vmem:[#allocation5 + $0x2d0] ss:$8 sps:$4 sm:$0xff]  }
  0x57   :  { %920 = vmatpush2.bf16.msra.mxu1 %v1257_v57  ;;  %880 = vmatprep.subr.bf16.mxu0 %v1258_v58  ;;  %v1341_v57 = vld [vmem:[#allocation5 + $0x3d0] ss:$8 sps:$4 sm:$0xff]   ;;  %v1346_v58 = vld [vmem:[#allocation5 + $0x2c4] ss:$8 sps:$4 sm:$0xff]  }
  0x58   :  { %921 = vmatprep.subr.bf16.mxu1 %v1260_v59  ;;  %v1349_v59 = vld [vmem:[#allocation5 + $0x3c4] ss:$8 sps:$4 sm:$0xff]  }
  0x5a   :  { %881 = vmatpush2.bf16.msra.mxu0 %v1262_v60  ;;  %v1344_v60 = vld [vmem:[#allocation5 + $0x2c0] ss:$8 sps:$4 sm:$0xff]  }
  0x5b   :  { %922 = vmatpush2.bf16.msra.mxu1 %v1263_v61  ;;  %882 = vmatprep.subr.bf16.mxu0 %v1264_v62  ;;  %v1347_v61 = vld [vmem:[#allocation5 + $0x3c0] ss:$8 sps:$4 sm:$0xff]   ;;  %v1352_v62 = vld [vmem:[#allocation5 + $0x2b4] ss:$8 sps:$4 sm:$0xff]  }
  0x5c   :  { %923 = vmatprep.subr.bf16.mxu1 %v1266_v63  ;;  %v1355_v63 = vld [vmem:[#allocation5 + $0x3b4] ss:$8 sps:$4 sm:$0xff]  }
  0x5e   :  { %883 = vmatpush2.bf16.msra.mxu0 %v1268_v0  ;;  %v1350_v0 = vld [vmem:[#allocation5 + $0x2b0] ss:$8 sps:$4 sm:$0xff]  }
  0x5f   :  { %924 = vmatpush2.bf16.msra.mxu1 %v1269_v1  ;;  %884 = vmatprep.subr.bf16.mxu0 %v1270_v2  ;;  %v1353_v1 = vld [vmem:[#allocation5 + $0x3b0] ss:$8 sps:$4 sm:$0xff]   ;;  %v1358_v2 = vld [vmem:[#allocation5 + $0x2a4] ss:$8 sps:$4 sm:$0xff]  }
  0x60   :  { %925 = vmatprep.subr.bf16.mxu1 %v1272_v3  ;;  %v1361_v3 = vld [vmem:[#allocation5 + $0x3a4] ss:$8 sps:$4 sm:$0xff]  }
  0x62   :  { %885 = vmatpush2.bf16.msra.mxu0 %v1274_v4  ;;  %v1356_v4 = vld [vmem:[#allocation5 + $0x2a0] ss:$8 sps:$4 sm:$0xff]  }
  0x63   :  { %926 = vmatpush2.bf16.msra.mxu1 %v1275_v5  ;;  %936 = vmatprep.subr.bf16.mxu0 %v1280_v6  ;;  %v1359_v5 = vld [vmem:[#allocation5 + $0x3a0] ss:$8 sps:$4 sm:$0xff]   ;;  %v1364_v6 = vld [vmem:[#allocation5 + $0x294] ss:$8 sps:$4 sm:$0xff]  }
  0x64   :  { %977 = vmatprep.subr.bf16.mxu1 %v1283_v7  ;;  %v1367_v7 = vld [vmem:[#allocation5 + $0x394] ss:$8 sps:$4 sm:$0xff]  }
  0x65   :  { %887 = vmatmul.mubr.bf16.vlgmr.msra.gmra.mxu0 %v78_v8  ;;  %v1362_v8 = vld [vmem:[#allocation5 + $0x290] ss:$8 sps:$4 sm:$0xff]  }
  0x66   :  { %928 = vmatmul.mubr.bf16.vlgmr.msra.gmra.mxu1 %v80_v9  ;;  %937 = vmatpush1.bf16.msra.mxu0 %v1278_v10  ;;  %v1365_v9 = vld [vmem:[#allocation5 + $0x390] ss:$8 sps:$4 sm:$0xff]   ;;  %v1370_v10 = vld [vmem:[#allocation5 + $0x284] ss:$8 sps:$4 sm:$0xff]  }
  0x67   :  { %978 = vmatpush1.bf16.msra.mxu1 %v1281_v11  ;;  %938 = vmatprep.subr.bf16.mxu0 %v1286_v12  ;;  %v1373_v11 = vld [vmem:[#allocation5 + $0x384] ss:$8 sps:$4 sm:$0xff]   ;;  %v1368_v12 = vld [vmem:[#allocation5 + $0x280] ss:$8 sps:$4 sm:$0xff]  }
  0x68   :  { %979 = vmatprep.subr.bf16.mxu1 %v1289_v13  ;;  %968 = vmatprep.mubr.bf16.mxu0 %v83_v42  ;;  %v1371_v13 = vld [vmem:[#allocation5 + $0x380] ss:$8 sps:$4 sm:$0xff]  }
  0x69   :  { %1009 = vmatprep.mubr.bf16.mxu1 %v85_v43 }
  0x6a   :  { %939 = vmatpush1.bf16.msra.mxu0 %v1284_v14  ;;  %v82_v14 = vpack.c.bf16 %v1474_v34, %v1474_v34 }
  0x6b   :  { %980 = vmatpush1.bf16.msra.mxu1 %v1287_v15  ;;  %940 = vmatprep.subr.bf16.mxu0 %v1292_v16  ;;  %v84_v15 = vpack.c.bf16 %v1476_v35, %v1476_v35 }
  0x6c   :  { %981 = vmatprep.subr.bf16.mxu1 %v1295_v17 }
  0x6e   :  { %941 = vmatpush1.bf16.msra.mxu0 %v1290_v18 }
  0x6f   :  { %982 = vmatpush1.bf16.msra.mxu1 %v1293_v19  ;;  %942 = vmatprep.subr.bf16.mxu0 %v1298_v20 }
  0x70   :  { %983 = vmatprep.subr.bf16.mxu1 %v1301_v21 }
  0x72   :  { %943 = vmatpush1.bf16.msra.mxu0 %v1296_v22 }
  0x73   :  { %984 = vmatpush1.bf16.msra.mxu1 %v1299_v23  ;;  %944 = vmatprep.subr.bf16.mxu0 %v1304_v24 }
  0x74   :  { %985 = vmatprep.subr.bf16.mxu1 %v1307_v25 }
  0x76   :  { %945 = vmatpush1.bf16.msra.mxu0 %v1302_v26 }
  0x77   :  { %986 = vmatpush1.bf16.msra.mxu1 %v1305_v27  ;;  %946 = vmatprep.subr.bf16.mxu0 %v1310_v28 }
  0x78   :  { %987 = vmatprep.subr.bf16.mxu1 %v1313_v29 }
  0x7a   :  { %947 = vmatpush1.bf16.msra.mxu0 %v1308_v30 }
  0x7b   :  { %988 = vmatpush1.bf16.msra.mxu1 %v1311_v31  ;;  %948 = vmatprep.subr.bf16.mxu0 %v1316_v32  ;;  %v55_v31 = vld [vmem:[#allocation7] sm:$0xff] }
  0x7c   :  { %989 = vmatprep.subr.bf16.mxu1 %v1319_v33  ;;  %v56_v37 = vsub.f32 0.0, %v55_v31 }
  0x7e   :  { %949 = vmatpush1.bf16.msra.mxu0 %v1314_v38 }
  0x7f   :  { %990 = vmatpush1.bf16.msra.mxu1 %v1317_v39  ;;  %950 = vmatprep.subr.bf16.mxu0 %v1322_v40 }
  0x80   :  { %991 = vmatprep.subr.bf16.mxu1 %v1325_v41 }
  0x82   :  { %951 = vmatpush1.bf16.msra.mxu0 %v1320_v44 }
  0x83   :  { %992 = vmatpush1.bf16.msra.mxu1 %v1323_v45  ;;  %952 = vmatprep.subr.bf16.mxu0 %v1328_v46 }
  0x84   :  { %993 = vmatprep.subr.bf16.mxu1 %v1331_v47 }
  0x86   :  { %953 = vmatpush2.bf16.msra.mxu0 %v1326_v48 }
  0x87   :  { %994 = vmatpush2.bf16.msra.mxu1 %v1329_v49  ;;  %954 = vmatprep.subr.bf16.mxu0 %v1334_v50 }
  0x88   :  { %995 = vmatprep.subr.bf16.mxu1 %v1337_v51 }
  0x8a   :  { %955 = vmatpush2.bf16.msra.mxu0 %v1332_v52 }
  0x8b   :  { %996 = vmatpush2.bf16.msra.mxu1 %v1335_v53  ;;  %956 = vmatprep.subr.bf16.mxu0 %v1340_v54 }
  0x8c   :  { %997 = vmatprep.subr.bf16.mxu1 %v1343_v55 }
  0x8e   :  { %957 = vmatpush2.bf16.msra.mxu0 %v1338_v56 }
  0x8f   :  { %998 = vmatpush2.bf16.msra.mxu1 %v1341_v57  ;;  %958 = vmatprep.subr.bf16.mxu0 %v1346_v58 }
  0x90   :  { %999 = vmatprep.subr.bf16.mxu1 %v1349_v59 }
  0x92   :  { %959 = vmatpush2.bf16.msra.mxu0 %v1344_v60 }
  0x93   :  { %1000 = vmatpush2.bf16.msra.mxu1 %v1347_v61  ;;  %960 = vmatprep.subr.bf16.mxu0 %v1352_v62 }
  0x94   :  { %1001 = vmatprep.subr.bf16.mxu1 %v1355_v63 }
  0x96   :  { %961 = vmatpush2.bf16.msra.mxu0 %v1350_v0 }
  0x97   :  { %1002 = vmatpush2.bf16.msra.mxu1 %v1353_v1  ;;  %962 = vmatprep.subr.bf16.mxu0 %v1358_v2 }
  0x98   :  { %1003 = vmatprep.subr.bf16.mxu1 %v1361_v3 }
  0x9a   :  { %963 = vmatpush2.bf16.msra.mxu0 %v1356_v4 }
  0x9b   :  { %1004 = vmatpush2.bf16.msra.mxu1 %v1359_v5  ;;  %964 = vmatprep.subr.bf16.mxu0 %v1364_v6 }
  0x9c   :  { %1005 = vmatprep.subr.bf16.mxu1 %v1367_v7 }
  0x9e   :  { %965 = vmatpush2.bf16.msra.mxu0 %v1362_v8 }
  0x9f   :  { %1006 = vmatpush2.bf16.msra.mxu1 %v1365_v9  ;;  %966 = vmatprep.subr.bf16.mxu0 %v1370_v10 }
  0xa0   :  { %1007 = vmatprep.subr.bf16.mxu1 %v1373_v11 }
  0xa2   :  { %967 = vmatpush2.bf16.msra.mxu0 %v1368_v12 }
  0xa3   :  { %1008 = vmatpush2.bf16.msra.mxu1 %v1371_v13 }
  0xa5   :  { %969 = vmatmul.mubr.bf16.vlgmr.msra.gmra.mxu0 %v82_v14 }
  0xa6   :  { %1010 = vmatmul.mubr.bf16.vlgmr.msra.gmra.mxu1 %v84_v15 }
 0x125   :  { %v888_v16 = vpop.f32.mrf.mxu0 }
 0x126   :  { %v929_v17 = vpop.f32.mrf.mxu1 }
 0x127   :  { %v930_v18 = vadd.f32 %v929_v17, %v888_v16  ;;  %v890_v19 = vpop.f32.mrf.mxu0 }
 0x128   :  { %v931_v20 = vpop.f32.mrf.mxu1 }
 0x129   :  { %v892_v21 = vpop.f32.mrf.mxu0  ;;  %v932_v27 = vadd.f32 %v931_v20, %v890_v19 }
 0x12a   :  { %v933_v22 = vpop.f32.mrf.mxu1 }
 0x12b   :  { %v893_v23 = vpop.f32.mrf.mxu0 }
 0x12c   :  { %v934_v24 = vpop.f32.mrf.mxu1 }
 0x165   :  { %v970_v25 = vpop.f32.mrf.mxu0 }
 0x166   :  { %v1011_v26 = vpop.f32.mrf.mxu1  ;;  %v971_v28 = vadd.f32 %v970_v25, %v930_v18 }
 0x167   :  { %v972_v29 = vpop.f32.mrf.mxu0 }
 0x168   :  { %v1013_v30 = vpop.f32.mrf.mxu1  ;;  %v973_v32 = vadd.f32 %v972_v29, %v932_v27  ;;  %v1012_v35 = vadd.f32 %v1011_v26, %v971_v28 }
 0x169   :  { %v974_v33 = vpop.f32.mrf.mxu0 }
 0x16a   :  { %v1015_v34 = vpop.f32.mrf.mxu1  ;;  %v1014_v36 = vadd.f32 %v1013_v30, %v973_v32 }
 0x16b   :  { %v975_v38 = vpop.f32.mrf.mxu0 }
 0x16c   :  { %v1016_v39 = vpop.f32.mrf.mxu1  ;;  %v1020_v40 = vcombine.low %v1012_v35, %v1014_v36 }
 0x16e   :  { %v1022_v41 = vadd.f32 %v1020_v40, %v56_v37 }
 0x170   :  { %v1028_v42 = vmul.f32 %v1022_v41, %v1022_v41 }
 0x172   :  { %v1030_v43 = vcombine.high %v1028_v42, %v1028_v42  ;;  %v1033_v44 = vsel %vm1032_vm0, %v1028_v42, 0.0 }
 0x174   :  { %v1034_v45 = vsel %vm1032_vm0, %v1030_v43, 0.0 }
 0x175   :  { %v1035_v46 = vadd.f32 %v1034_v45, %v1033_v44 }
 0x177   :  { %1036 = vadd.xlane.f32.xlu0 %v1035_v46 }
 0x200   :  { %v1037_v47 = vpop.xlane.xlu0 %1036 }
 0x201   :  { %v1038_v48 = vmul.f32 0.5, %v1037_v47 }
 0x203   :  { %1040 = vst.msk [vmem:[%s1492_s3] sm:$0xf] %vm1039_vm1, %v1038_v48 }
 0x204   :  { %1045 = vsyncpa [#allocation4], 1 }
 0x205   :  { %1046 = vsyncpa [#allocation6], 1 }

</bundles_post_ra>
